<compile_context>
chip_gen: v7x
topology: tpu7x:2x2x1
jax: 0.10.0
libtpu: 0.0.40
codegen_flags: <defaults>
</compile_context>

<pallas_src>
import functools
import math

import jax
import jax.numpy as jnp
from jax.experimental import pallas as pl
from jax.experimental.pallas import tpu as pltpu


def _conv1x1_kernel(w_ref, x_ref, o_ref, *, relu: bool):
    # w_ref: (C_out, C_in)   -- VMEM-resident weight.
    # x_ref: (1, C_in, TL)   -- NCL-native input tile (lane-dense along L).
    # o_ref: (1, C_out, TL)  -- NCL-native output tile (lane-dense along L).
    y = jnp.dot(w_ref[...], x_ref[0], preferred_element_type=jnp.float32)
    if relu:
        y = jnp.maximum(y, 0.0)
    o_ref[0] = y.astype(o_ref.dtype)


def initialized_conv1d(x, weight, *, relu: bool = False, tile_l: int = 1024):
    """Pointwise Conv1d (kernel_size=1, stride=1, padding=0, groups=1, no bias).

    Args:
      x:      (N, C_in, L) float32  -- PyTorch NCL layout.
      weight: (C_out, C_in, 1) float32 -- nn.Conv1d weight layout.
      relu:   apply ReLU after the conv (static flag, baked into the kernel).
      tile_l: lane-tile size along L for large inputs (multiple of 128).

    Returns:
      (N, C_out, L) float32, same layout as PyTorch output.
    """
    n, c_in, length = x.shape
    c_out = weight.shape[0]
    assert weight.shape == (c_out, c_in, 1), "only kernel_size=1 supported"
    # TODO(synk): kernel_size>1 / stride / padding / groups>1 variants would
    # need a windowed/grouped conv kernel; module defaults (k=1, g=1) covered.

    w2d = weight[:, :, 0]  # (C_out, C_in)

    if length <= tile_l:
        tl = length                 # full-extent block: no (8,128) constraint
        grid_l = 1
    else:
        tl = tile_l                 # multiple of 128 -> lane-dense stores
        grid_l = pl.cdiv(length, tl)  # partial last block handled by Pallas

    grid = (n, grid_l)

    flops = 2 * n * length * c_in * c_out
    bytes_accessed = 4 * (n * c_in * length + c_in * c_out + n * c_out * length)

    kernel = functools.partial(_conv1x1_kernel, relu=relu)

    return pl.pallas_call(
        kernel,
        out_shape=jax.ShapeDtypeStruct((n, c_out, length), x.dtype),
        grid_spec=pltpu.PrefetchScalarGridSpec(
            num_scalar_prefetch=0,
            grid=grid,
            in_specs=[
                # Weight: resident, DMA'd once.
                pl.BlockSpec((c_out, c_in), lambda b, l: (0, 0)),
                # Input: one batch row, one L tile per grid step.
                pl.BlockSpec((1, c_in, tl), lambda b, l: (b, 0, l)),
            ],
            out_specs=pl.BlockSpec((1, c_out, tl), lambda b, l: (b, 0, l)),
        ),
        compiler_params=pltpu.CompilerParams(
            dimension_semantics=("parallel", "parallel")),
        cost_estimate=pl.CostEstimate(
            flops=flops, transcendentals=0, bytes_accessed=bytes_accessed),
    )(w2d, x)


def _reference(x, weight, relu):
    # Pure-JAX reference of F.conv1d(x, weight) with k=1, groups=1, no bias.
    y = jnp.einsum("ncl,oc->nol", x, weight[:, :, 0])
    return jnp.maximum(y, 0.0) if relu else y


if __name__ == "__main__":
    key = jax.random.PRNGKey(0)
    kx, kw, kx2 = jax.random.split(key, 3)

    # Shapes consistent with Initialized_Conv1d's forward: (N, C_in, L).
    n, c_in, c_out, length = 2, 4, 8, 16
    x = jax.random.normal(kx, (n, c_in, length), dtype=jnp.float32)

    # Deterministic Conv1d weight init (kaiming-uniform-style bounds, like
    # nn.Conv1d default), shape (out_channels, in_channels, kernel_size=1).
    bound = 1.0 / math.sqrt(c_in * 1)
    weight = jax.random.uniform(
        kw, (c_out, c_in, 1), dtype=jnp.float32, minval=-bound, maxval=bound)

    # relu=True branch (single full-extent L block path).
    y = initialized_conv1d(x, weight, relu=True)
    jax.block_until_ready(y)
    assert y.shape == (n, c_out, length)
    assert jnp.allclose(y, _reference(x, weight, relu=True), atol=1e-5, rtol=1e-5)

    # relu=False branch.
    y2 = initialized_conv1d(x, weight, relu=False)
    jax.block_until_ready(y2)
    assert jnp.allclose(y2, _reference(x, weight, relu=False), atol=1e-5, rtol=1e-5)

    # Exercise the tiled-L (multi-step, pipelined) path with a small tile size.
    length2 = 384
    x_big = jax.random.normal(kx2, (n, c_in, length2), dtype=jnp.float32)
    y3 = initialized_conv1d(x_big, weight, relu=True, tile_l=128)
    jax.block_until_ready(y3)
    assert y3.shape == (n, c_out, length2)
    assert jnp.allclose(y3, _reference(x_big, weight, relu=True),
                        atol=1e-5, rtol=1e-5)

    print("KERNEL_OK")
</pallas_src>

<mosaic_0001>
module attributes {stable_mosaic.version = 11 : i64} {
  func.func @_conv1x1_kernel(%arg0: i32, %arg1: i32, %arg2: memref<8x4xf32, #tpu.memory_space<vmem>>, %arg3: memref<1x4x16xf32, #tpu.memory_space<vmem>>, %arg4: memref<1x8x16xf32, #tpu.memory_space<vmem>>) attributes {dimension_semantics = [#tpu.dimension_semantics<parallel>, #tpu.dimension_semantics<parallel>], iteration_bounds = array<i64: 2, 1>, scalar_prefetch = 0 : i64, scratch_operands = 0 : i64, tpu.core_type = #tpu.core_type<tc>, window_params = [{pipeline_mode = #tpu.pipeline_mode<synchronous>, transform_indices = @transform_0, window_bounds = array<i64: 8, 4>}, {transform_indices = @transform_1, window_bounds = array<i64: 1, 4, 16>}, {transform_indices = @transform_2, window_bounds = array<i64: 1, 8, 16>}]} {
    %c0 = arith.constant 0 : index
    %c0_0 = arith.constant 0 : index
    %0 = vector.load %arg2[%c0, %c0_0] : memref<8x4xf32, #tpu.memory_space<vmem>>, vector<8x4xf32>
    %c0_1 = arith.constant 0 : index
    %c0_2 = arith.constant 0 : index
    %c0_3 = arith.constant 0 : index
    %1 = vector.load %arg3[%c0_1, %c0_2, %c0_3] : memref<1x4x16xf32, #tpu.memory_space<vmem>>, vector<1x4x16xf32>
    %2 = vector.shape_cast %1 : vector<1x4x16xf32> to vector<4x16xf32>
    %cst = arith.constant dense<0.000000e+00> : vector<8x16xf32>
    %3 = tpu.matmul %0, %2, %cst {dimension_numbers = #tpu.dot_dimension_numbers<[1], [0], [0], [1], [0, 0, 1, 1], [], []>} : vector<8x4xf32>, vector<4x16xf32>, vector<8x16xf32> -> vector<8x16xf32>
    %cst_4 = arith.constant 0.000000e+00 : f32
    %4 = vector.broadcast %cst_4 : f32 to vector<8x16xf32>
    %5 = arith.maximumf %3, %4 : vector<8x16xf32>
    %c0_5 = arith.constant 0 : index
    %c0_6 = arith.constant 0 : index
    %c0_7 = arith.constant 0 : index
    %6 = vector.load %arg4[%c0_5, %c0_6, %c0_7] : memref<1x8x16xf32, #tpu.memory_space<vmem>>, vector<1x8x16xf32>
    %7 = vector.shape_cast %6 : vector<1x8x16xf32> to vector<8x16xf32>
    %8 = vector.shape_cast %5 : vector<8x16xf32> to vector<1x8x16xf32>
    tpu.vector_store %arg4[%c0_5, %c0_6, %c0_7], %8 {strides = array<i32>} : memref<1x8x16xf32, #tpu.memory_space<vmem>>, vector<1x8x16xf32>,
    return
  }
  func.func @transform_0(%arg0: i32, %arg1: i32) -> (i32, i32) {
    %c0_i32 = arith.constant 0 : i32
    %c0_i32_0 = arith.constant 0 : i32
    %c0_i32_1 = arith.constant 0 : i32
    return %c0_i32, %c0_i32_0 : i32, i32
  }
  func.func @transform_1(%arg0: i32, %arg1: i32) -> (i32, i32, i32) {
    %c0_i32 = arith.constant 0 : i32
    %c0_i32_0 = arith.constant 0 : i32
    return %arg0, %c0_i32, %arg1 : i32, i32, i32
  }
  func.func @transform_2(%arg0: i32, %arg1: i32) -> (i32, i32, i32) {
    %c0_i32 = arith.constant 0 : i32
    %c0_i32_0 = arith.constant 0 : i32
    return %arg0, %c0_i32, %arg1 : i32, i32, i32
  }
}

</mosaic_0001>

<bundles_post_ra>
// kernel: tpu_custom_call.1
= control target key start
LH: loop header
LB: loop body
LE: loop exit
PB: predicated region body
PF: predicated region fallthrough
CT: control target
= control target key end

     0   :  { %7 = vsyncpa [#allocation3], 0  ;;  %s623_s0 = inlined_call_operand.vmem [shape: f32[8,4], index: 0, kind: input, shape index: {}]   ;;  %s624_s1 = inlined_call_operand.vmem [shape: f32[2,4,16], index: 1, kind: input, shape index: {}]   ;;  %s625_s2 = inlined_call_operand.hbm [shape: f32[2,8,16], index: 2, kind: output, shape index: {}]  }
   0x1   :  { %9 = vsyncpa [#allocation3 + $0x1], 0  ;;  %s508_s9 = smov 0   ;;  %s510_s10 = smov 0  }
   0x2   :  { %s512_s11 = smov 0   ;;  %s514_s12 = smov 0  }
   0x3   :  { %s516_s13 = smov 0   ;;  %s518_s14 = smov 0  }
   0x4 LB: > { %s333_s15 = sadd.s32 4294967295, %s488_s14   ;;  %s334_s16 = sadd.s32 4294967294, %s488_s14   ;;  %s488_s14 = sphi %s518_s14, %s15_s14   ;;  %s484_s13 = sphi %s516_s13, %s632_s13   ;;  %s480_s12 = sphi %s514_s12, %s631_s12   ;;  %s476_s11 = sphi %s512_s11, %s630_s11   ;;  %s472_s10 = sphi %s510_s10, %s629_s10   ;;  %s468_s9 = sphi %s508_s9, %s628_s9  }
   0x5   : > { %s27_s17 = sadd.s32 1, %s484_s13  ;;  %s85_s18 = sadd.s32 1, %s476_s11 }
   0x6   : > { %p29_p0 = scmp.ge.s32.totalorder %s27_s17, 2  ;;  %p95_p1 = scmp.ne.s32.totalorder %s476_s11, %s472_s10 }
   0x7   : > { %p96_p2 = scmp.eq.s32.totalorder %s333_s15, 1  ;;  %p101_p3 = scmp.ne.s32.totalorder %s472_s10, %s468_s9 }
   0x8   : > { %s634_s17 = smov (%p29_p0, %s27_s17), 0  ;;  %p102_p5 = scmp.eq.s32.totalorder %s334_s16, 1 }
   0x9   : > { %p548_p4 = por %p96_p2, %p95_p1  ;;  %s80_s20 = ssub.s32 %s484_s13, %s634_s17 }
   0xa   : > { %p337_p6 = scmp.ge.s32.totalorder %s488_s14, 1  ;;  %p83_p7 = scmp.eq.s32.totalorder %s80_s20, 0 }
   0xb   : > { %p555_p8 = por %p102_p5, %p101_p3  ;;  %p133_p9 = scmp.lt.s32.totalorder %s488_s14, 3 }
   0xc   : > { %s561_s22 = scalar_select %p83_p7, %s476_s11, %s85_s18  }
   0xd   : > { %p134_p10 = pnand %p337_p6, %p133_p9 }
   0xe   : > { %p157_p11 = scmp.lt.s32.totalorder (!%p134_p10), %s480_s12, 1  ;;  %v490_v0 = vmov (!%p134_p10), 0.0   ;;  %vm491_vm0 = vmmov (!%p134_p10), 0   ;;  %vm170_vm1 = vcmask (!%p134_p10), 1043456   ;;  %v164_v1 = vld [vmem:[%s623_s0] sm:$0xff] (!%p134_p10)  ;;  %vm166_vm2 = vcmask (!%p134_p10), 31744  }
   0xf   : > { %137 = sbr.rel (%p134_p10) target bundleno = 256 (0x100), region = 28  ;;  %348 = vmatprep.subr.mxu0 (!%p134_p10), %v490_v0  ;;  %350 = vmatprep.mubr.msk.f32.mxu0 (!%p134_p10), %vm491_vm0, %v490_v0  ;;  %s154_s30 = sand.u32 (!%p134_p10), 1, %s472_s10   ;;  %vm245_vm3 = vcmask (!%p134_p10), 130048  }
  0x10   : > { %s338_s3 = sshll.u32 (!%p134_p10), %s154_s30, 3  ;;  %s343_s4 = sshll.u32 (!%p134_p10), %s480_s12, 7 }
  0x11   : > { %s156_s5 = scalar_lea.vmem (!%p134_p10), [#allocation2], %s338_s3  ;;  %s576_s15 = scalar_lea.hbm (!%p134_p10), %s625_s2, %s343_s4 }
  0x12   : > { %s262_s6 = sshll.u32 (!%p134_p10), %s156_s5, 4  ;;  %s248_s16 = scalar_lea.sflag (!%p134_p10), [#allocation3], %s154_s30  ;;  %s578_s6 = int_to_ptr.vmem [resolvable:$true] %s262_s6 }
  0x13   : > { %s410_s18 = scalar_lea.vmem (!%p134_p10), %s578_s6, 128 }
  0x14   : > { %p411_p12 = scmp.ne.s32.totalorder (!%p134_p10), %s578_s6, %s410_s18 }
  0x16   : > { %s158_s23 = scalar_select %p157_p11, %s480_s12, 1 }
  0x17   : > { %p412_p13 = pnand %p411_p12, %p548_p4  ;;  %s492_s12 = smov [#allocation2]  }
  0x18   : > { %s339_s24 = sshll.u32 %s158_s23, 2  ;;  %s414_s20 = sshll.u32 %s492_s12, 4  ;;  %s415_s20 = int_to_ptr.vmem [resolvable:$false] %s414_s20 }
  0x19   : > { %s163_s27 = scalar_lea.vmem %s624_s1, %s339_s24  ;;  %p413_p0 = pneg %p412_p13 }
  0x1a   : > { %v165_v2 = vld [vmem:[%s163_s27] sm:$0xf]  ;;  %s416_s23 = scalar_lea.vmem %s415_s20, 256  ;;  %p417_p1 = scmp.lt.s32.totalorder %s578_s6, %s415_s20 }
  0x1b   : > { %349 = vmatpush3.msk.msra.mxu0 %vm170_vm1, %v165_v2  ;;  %p418_p2 = scmp.lt.s32.totalorder %s416_s23, %s410_s18 }
  0x1c   : > { %351 = vmatmul.mubr.msk.f32.vlgmr.msra.gmra.mrb[0].mxu0 %vm166_vm2, %v164_v1 }
  0x1d   : > { %p419_p3 = por %p418_p2, %p417_p1 }
  0x1f   : > { %p420_p5 = pnand %p419_p3, %p413_p0 }
  0xef   : > { %v240_v3 = vpop.f32.mrb[0].mxu0 }
  0xf0   : > { %v244_v4 = vmax.f32 %v240_v3, 0.0  ;;  %v352_v5 = vpop.f32.mrb[1].mxu0 }
  0xf2   : > { %246 = vst.msk [vmem:[%s156_s5] sm:$0xff] %vm245_vm3, %v244_v4 }
  0xf3   : > { %423 = shalt.err (!%p420_p5)
}
  0xf4   : > { %s424_s24 = scalar_lea.hbm %s576_s15, 128  ;;  %s428_s27 = scalar_lea.hbm %s625_s2, 256 }
  0xf5   : > { %p425_p6 = scmp.ne.s32.totalorder %s576_s15, %s424_s24  ;;  %p429_p10 = scmp.lt.u32.totalorder %s576_s15, %s625_s2 }
  0xf6   : > { %p430_p11 = scmp.lt.u32.totalorder %s428_s27, %s424_s24  ;;  %p432_p13 = scmp.lt.u32.totalorder %s424_s24, %s576_s15 }
  0xf7   : > { %p426_p7 = pnand %p425_p6, %p548_p4 }
  0xf8   : > { %p431_p12 = por %p430_p11, %p429_p10 }
  0xf9   : > { %p427_p9 = pneg %p426_p7 }
  0xfa   : > { %p433_p0 = por %p432_p13, %p431_p12 }
  0xfc   : > { %p434_p1 = pnand %p433_p0, %p427_p9 }
  0xfe   : > { %437 = shalt.err (!%p434_p1)
}
  0xff   : > { %353 = dma.vmem_to_hbm [thread:$0]  (%p548_p4), %s578_s6, 128, %s576_s15, %s248_s16  }
 0x100 PF: > { %p359_p2 = scmp.ge.s32.totalorder %s488_s14, 2  ;;  %s274_s30 = sand.u32 1, %s468_s9  }
 0x101   : > { %s275_s3 = scalar_lea.sflag [#allocation3], %s274_s30 }
 0x102   : > { %p356_p3 = pnand %p359_p2, %p555_p8 }
 0x104   : > { %463 = dma.done.wait (!%p356_p3), %s275_s3, 128  }
 0x105   : > { %465 = vsyncadd (!%p356_p3), %s275_s3, 4294967168  ;;  %s15_s14 = sadd.s32 1, %s488_s14   ;;  %s628_s9 = smov %s472_s10 }
 0x106   : > { %p12_p5 = scmp.ge.s32.totalorder %s15_s14, 4   ;;  %s629_s10 = smov %s476_s11 }
 0x107   : > { %s630_s11 = smov %s561_s22  ;;  %s631_s12 = smov %s484_s13 }
 0x108   : > { %s632_s13 = smov %s634_s17  ;;  %14 = sbr.rel (!%p12_p5) target bundleno = 4 (0x4), region = 63 }
 0x10f   :  { %280 = vsyncpa [#allocation3], 1 }
 0x110   :  { %282 = vsyncpa [#allocation3 + $0x1], 1 }

</bundles_post_ra>
